<compile_context>
chip_gen: v7x
topology: tpu7x:2x2x1
jax: 0.10.0
libtpu: 0.0.40
codegen_flags: <defaults>
</compile_context>

<pallas_src>
import functools

import jax
import jax.numpy as jnp
from jax.experimental import pallas as pl
from jax.experimental.pallas import tpu as pltpu


def _round_up(x, m):
    return ((x + m - 1) // m) * m


def _choose_batch_tile(B):
    """Batch tile: 8-aligned whole batch for small B; for B >= 256 pick the tile
    from {1024,512,256,128} that gives >= 2 grid steps (v7x megacore) with the
    least batch padding, preferring bigger tiles to amortize per-step overhead."""
    if B < 256:
        return _round_up(max(B, 8), 8)
    cands = [tb for tb in (1024, 512, 256, 128) if _round_up(B, tb) // tb >= 2]
    if not cands:
        cands = [128]
    return min(cands, key=lambda tb: (_round_up(B, tb) - B, -tb))


def _vmem_cap_bytes():
    """~80% of physical VMEM (generation-aware); conservative fallback = v7x 64 MiB."""
    try:
        cap = int(pltpu.get_tpu_info().vmem_capacity_bytes)
    except Exception:  # pragma: no cover - interpret mode / older runtimes
        cap = 64 << 20
    return int(cap * 0.8)


def _vae_kernel(x_ref, eps_ref,
                w1_ref, b1_ref, w2_ref, b2_ref,
                wh_ref, bh_ref,
                wd1_ref, bd1_ref, wd2_ref, bd2_ref, wd3_ref, bd3_ref,
                xrec_ref, ml_ref, *, latent_dim):
    bf16 = jnp.bfloat16
    f32 = jnp.float32

    # ----- encoder: Linear -> ReLU -> Linear -> ReLU (bf16 MXU, f32 accum) -----
    x = x_ref[...].astype(bf16)
    h = jnp.dot(x, w1_ref[...], preferred_element_type=f32) + b1_ref[...]
    h = jnp.maximum(h, 0.0)
    h = jnp.dot(h.astype(bf16), w2_ref[...], preferred_element_type=f32) + b2_ref[...]
    h = jnp.maximum(h, 0.0)

    # ----- fused latent heads: one (HID, 2*latent) matmul -> mu || logvar -----
    ml = jnp.dot(h.astype(bf16), wh_ref[...], preferred_element_type=f32) + bh_ref[...]
    mu = ml[:, :latent_dim]
    logvar = ml[:, latent_dim:]

    # ----- reparameterize: z = mu + eps * exp(0.5 * logvar)  (f32 elementwise) -----
    z = mu + eps_ref[...] * jnp.exp(0.5 * logvar)

    # ----- decoder: Linear -> ReLU -> Linear -> ReLU -> Linear -----
    d = jnp.dot(z.astype(bf16), wd1_ref[...], preferred_element_type=f32) + bd1_ref[...]
    d = jnp.maximum(d, 0.0)
    d = jnp.dot(d.astype(bf16), wd2_ref[...], preferred_element_type=f32) + bd2_ref[...]
    d = jnp.maximum(d, 0.0)
    xrec = jnp.dot(d.astype(bf16), wd3_ref[...], preferred_element_type=f32) + bd3_ref[...]

    xrec_ref[...] = xrec
    ml_ref[...] = ml


@functools.partial(jax.jit, static_argnames=("return_latent",))
def vae_forward(x, eps, params, return_latent=False):
    """Full VAE forward pass in one gridded Pallas kernel.

    Args:
      x:   (B, input_dim) float32
      eps: (B, latent_dim) float32 standard-normal noise (torch.randn_like)
      params: dict of weights (in, out) f32 and biases (1, out) f32
    Returns:
      (x_recon, mu, logvar) [+ z if return_latent], original (unpadded) shapes.
    """
    B, input_dim = x.shape
    latent_dim = params["wmu"].shape[1]
    hidden_dim = params["w1"].shape[1]

    f32 = jnp.float32
    bf16 = jnp.bfloat16

    TB = _choose_batch_tile(B)
    B_pad = _round_up(B, TB)

    # Batch padding only (no feature-dim padding); padded rows are sliced away.
    xp, epsp = x.astype(f32), eps.astype(f32)
    if B_pad != B:
        xp = jnp.pad(xp, ((0, B_pad - B), (0, 0)))
        epsp = jnp.pad(epsp, ((0, B_pad - B), (0, 0)))

    # Weights -> bf16 (MXU operands); biases stay f32 (added after f32 accumulation).
    wcast = lambda a: a.astype(bf16)
    bcast = lambda a: a.astype(f32)

    w1, b1 = wcast(params["w1"]), bcast(params["b1"])
    w2, b2 = wcast(params["w2"]), bcast(params["b2"])
    wh = jnp.concatenate([wcast(params["wmu"]), wcast(params["wlv"])], axis=1)  # (HID, 2*LAT)
    bh = jnp.concatenate([bcast(params["bmu"]), bcast(params["blv"])], axis=1)  # (1, 2*LAT)
    wd1, bd1 = wcast(params["wd1"]), bcast(params["bd1"])
    wd2, bd2 = wcast(params["wd2"]), bcast(params["bd2"])
    wd3, bd3 = wcast(params["wd3"]), bcast(params["bd3"])

    weights = (w1, b1, w2, b2, wh, bh, wd1, bd1, wd2, bd2, wd3, bd3)

    grid = (B_pad // TB,)

    def batch_spec(cols):
        return pl.BlockSpec((TB, cols), lambda i: (i, 0))

    def resident_spec(arr):
        # Whole-array block, constant index map -> DMA'd once, stays in VMEM.
        return pl.BlockSpec(arr.shape, lambda i: (0, 0))

    in_specs = [batch_spec(input_dim), batch_spec(latent_dim)] + \
               [resident_spec(w) for w in weights]
    out_specs = (batch_spec(input_dim), batch_spec(2 * latent_dim))

    # Cost estimate (helps XLA schedule around the custom call).
    flops = 2 * B_pad * (input_dim * hidden_dim + hidden_dim * hidden_dim
                         + hidden_dim * 2 * latent_dim + latent_dim * hidden_dim
                         + hidden_dim * hidden_dim + hidden_dim * input_dim)
    weight_bytes = sum(int(a.size) * a.dtype.itemsize for a in weights)
    io_bytes = 4 * (int(xp.size) + int(epsp.size)
                    + B_pad * (input_dim + 2 * latent_dim))
    cost = pl.CostEstimate(flops=int(flops),
                           transcendentals=int(B_pad * latent_dim),
                           bytes_accessed=int(weight_bytes + io_bytes))

    # VMEM budget: 2x resident weights (default double-buffering), 2x in/out
    # batch tiles, f32 + bf16 intermediate activations, plus headroom; capped
    # generation-aware (~51 MiB v7x, ~102 MiB v5e/v6e).
    tile_in_bytes = 4 * TB * (input_dim + latent_dim)
    tile_out_bytes = 4 * TB * (input_dim + 2 * latent_dim)
    act_bytes = TB * (6 * hidden_dim + 8 * latent_dim + 4 * input_dim) * 4
    vmem_budget = (2 * weight_bytes + 2 * (tile_in_bytes + tile_out_bytes)
                   + act_bytes + (4 << 20))
    vmem_limit = int(min(max(vmem_budget, 16 << 20), _vmem_cap_bytes()))

    xr, ml = pl.pallas_call(
        functools.partial(_vae_kernel, latent_dim=latent_dim),
        out_shape=(
            jax.ShapeDtypeStruct((B_pad, input_dim), f32),       # x_recon
            jax.ShapeDtypeStruct((B_pad, 2 * latent_dim), f32),  # mu || logvar
        ),
        grid=grid,
        in_specs=in_specs,
        out_specs=out_specs,
        compiler_params=pltpu.CompilerParams(
            dimension_semantics=("parallel",),
            vmem_limit_bytes=vmem_limit,
        ),
        cost_estimate=cost,
    )(xp, epsp, *weights)

    x_recon = xr[:B]
    mu = ml[:B, :latent_dim]
    logvar = ml[:B, latent_dim:]

    if return_latent:
        z = mu + eps * jnp.exp(0.5 * logvar)
        return x_recon, mu, logvar, z
    return x_recon, mu, logvar


def init_params(key, input_dim, hidden_dim, latent_dim):
    """Deterministic synthetic parameters (shapes match the PyTorch module)."""
    def linear(k, fan_in, fan_out):
        kw, kb = jax.random.split(k)
        bound = 1.0 / jnp.sqrt(fan_in)
        w = jax.random.uniform(kw, (fan_in, fan_out), jnp.float32, -bound, bound)
        b = jax.random.uniform(kb, (1, fan_out), jnp.float32, -bound, bound)
        return w, b

    keys = jax.random.split(key, 7)
    p = {}
    p["w1"], p["b1"] = linear(keys[0], input_dim, hidden_dim)
    p["w2"], p["b2"] = linear(keys[1], hidden_dim, hidden_dim)
    p["wmu"], p["bmu"] = linear(keys[2], hidden_dim, latent_dim)
    p["wlv"], p["blv"] = linear(keys[3], hidden_dim, latent_dim)
    p["wd1"], p["bd1"] = linear(keys[4], latent_dim, hidden_dim)
    p["wd2"], p["bd2"] = linear(keys[5], hidden_dim, hidden_dim)
    p["wd3"], p["bd3"] = linear(keys[6], hidden_dim, input_dim)
    return p


def vae_forward_ref(x, eps, p):
    """Pure-JAX f32 reference matching the PyTorch forward."""
    relu = lambda v: jnp.maximum(v, 0.0)
    h = relu(x @ p["w1"] + p["b1"])
    h = relu(h @ p["w2"] + p["b2"])
    mu = h @ p["wmu"] + p["bmu"]
    logvar = h @ p["wlv"] + p["blv"]
    z = mu + eps * jnp.exp(0.5 * logvar)
    d = relu(z @ p["wd1"] + p["bd1"])
    d = relu(d @ p["wd2"] + p["bd2"])
    x_recon = d @ p["wd3"] + p["bd3"]
    return x_recon, mu, logvar


if __name__ == "__main__":
    # Small shapes consistent with the module defaults.
    B, INPUT_DIM, HIDDEN_DIM, LATENT_DIM = 8, 16, 256, 32

    key = jax.random.PRNGKey(0)
    k_x, k_eps, k_p = jax.random.split(key, 3)

    x = jax.random.normal(k_x, (B, INPUT_DIM), jnp.float32)
    # torch.randn_like(std) -> standard normal noise, generated host-side for
    # determinism and passed in; the reparameterization itself runs in-kernel.
    eps = jax.random.normal(k_eps, (B, LATENT_DIM), jnp.float32)
    params = init_params(k_p, INPUT_DIM, HIDDEN_DIM, LATENT_DIM)

    x_recon, mu, logvar = vae_forward(x, eps, params)
    jax.block_until_ready((x_recon, mu, logvar))

    # Verify against pure-JAX f32 reference (tolerances loosened for bf16 MXU operands).
    xr_ref, mu_ref, lv_ref = vae_forward_ref(x, eps, params)
    assert x_recon.shape == (B, INPUT_DIM)
    assert mu.shape == (B, LATENT_DIM) and logvar.shape == (B, LATENT_DIM)
    assert jnp.allclose(x_recon, xr_ref, atol=5e-2, rtol=5e-2)
    assert jnp.allclose(mu, mu_ref, atol=5e-2, rtol=5e-2)
    assert jnp.allclose(logvar, lv_ref, atol=5e-2, rtol=5e-2)

    print("KERNEL_OK")
</pallas_src>

<mosaic_0001>
module attributes {stable_mosaic.version = 11 : i64} {
  func.func @_vae_kernel(%arg0: i32, %arg1: memref<8x16xf32, #tpu.memory_space<vmem>>, %arg2: memref<8x32xf32, #tpu.memory_space<vmem>>, %arg3: memref<16x256xbf16, #tpu.memory_space<vmem>>, %arg4: memref<1x256xf32, #tpu.memory_space<vmem>>, %arg5: memref<256x256xbf16, #tpu.memory_space<vmem>>, %arg6: memref<1x256xf32, #tpu.memory_space<vmem>>, %arg7: memref<256x64xbf16, #tpu.memory_space<vmem>>, %arg8: memref<1x64xf32, #tpu.memory_space<vmem>>, %arg9: memref<32x256xbf16, #tpu.memory_space<vmem>>, %arg10: memref<1x256xf32, #tpu.memory_space<vmem>>, %arg11: memref<256x256xbf16, #tpu.memory_space<vmem>>, %arg12: memref<1x256xf32, #tpu.memory_space<vmem>>, %arg13: memref<256x16xbf16, #tpu.memory_space<vmem>>, %arg14: memref<1x16xf32, #tpu.memory_space<vmem>>, %arg15: memref<8x16xf32, #tpu.memory_space<vmem>>, %arg16: memref<8x64xf32, #tpu.memory_space<vmem>>) attributes {dimension_semantics = [#tpu.dimension_semantics<parallel>], iteration_bounds = array<i64: 1>, scalar_prefetch = 0 : i64, scratch_operands = 0 : i64, tpu.core_type = #tpu.core_type<tc>, window_params = [{transform_indices = @transform_0, window_bounds = array<i64: 8, 16>}, {transform_indices = @transform_1, window_bounds = array<i64: 8, 32>}, {pipeline_mode = #tpu.pipeline_mode<synchronous>, transform_indices = @transform_2, window_bounds = array<i64: 16, 256>}, {pipeline_mode = #tpu.pipeline_mode<synchronous>, transform_indices = @transform_3, window_bounds = array<i64: 1, 256>}, {pipeline_mode = #tpu.pipeline_mode<synchronous>, transform_indices = @transform_4, window_bounds = array<i64: 256, 256>}, {pipeline_mode = #tpu.pipeline_mode<synchronous>, transform_indices = @transform_5, window_bounds = array<i64: 1, 256>}, {pipeline_mode = #tpu.pipeline_mode<synchronous>, transform_indices = @transform_6, window_bounds = array<i64: 256, 64>}, {pipeline_mode = #tpu.pipeline_mode<synchronous>, transform_indices = @transform_7, window_bounds = array<i64: 1, 64>}, {pipeline_mode = #tpu.pipeline_mode<synchronous>, transform_indices = @transform_8, window_bounds = array<i64: 32, 256>}, {pipeline_mode = #tpu.pipeline_mode<synchronous>, transform_indices = @transform_9, window_bounds = array<i64: 1, 256>}, {pipeline_mode = #tpu.pipeline_mode<synchronous>, transform_indices = @transform_10, window_bounds = array<i64: 256, 256>}, {pipeline_mode = #tpu.pipeline_mode<synchronous>, transform_indices = @transform_11, window_bounds = array<i64: 1, 256>}, {pipeline_mode = #tpu.pipeline_mode<synchronous>, transform_indices = @transform_12, window_bounds = array<i64: 256, 16>}, {pipeline_mode = #tpu.pipeline_mode<synchronous>, transform_indices = @transform_13, window_bounds = array<i64: 1, 16>}, {transform_indices = @transform_14, window_bounds = array<i64: 8, 16>}, {transform_indices = @transform_15, window_bounds = array<i64: 8, 64>}]} {
    %c0 = arith.constant 0 : index
    %c0_0 = arith.constant 0 : index
    %0 = vector.load %arg1[%c0, %c0_0] : memref<8x16xf32, #tpu.memory_space<vmem>>, vector<8x16xf32>
    %1 = arith.truncf %0 : vector<8x16xf32> to vector<8x16xbf16>
    %c0_1 = arith.constant 0 : index
    %c0_2 = arith.constant 0 : index
    %2 = vector.load %arg3[%c0_1, %c0_2] : memref<16x256xbf16, #tpu.memory_space<vmem>>, vector<16x256xbf16>
    %cst = arith.constant dense<0.000000e+00> : vector<8x256xf32>
    %3 = tpu.matmul %1, %2, %cst {dimension_numbers = #tpu.dot_dimension_numbers<[1], [0], [0], [1], [0, 0, 1, 1], [], []>} : vector<8x16xbf16>, vector<16x256xbf16>, vector<8x256xf32> -> vector<8x256xf32>
    %c0_3 = arith.constant 0 : index
    %c0_4 = arith.constant 0 : index
    %4 = vector.load %arg4[%c0_3, %c0_4] : memref<1x256xf32, #tpu.memory_space<vmem>>, vector<1x256xf32>
    %5 = vector.broadcast %4 : vector<1x256xf32> to vector<8x256xf32>
    %6 = arith.addf %3, %5 : vector<8x256xf32>
    %cst_5 = arith.constant 0.000000e+00 : f32
    %7 = vector.broadcast %cst_5 : f32 to vector<8x256xf32>
    %8 = arith.maximumf %6, %7 : vector<8x256xf32>
    %9 = arith.truncf %8 : vector<8x256xf32> to vector<8x256xbf16>
    %c0_6 = arith.constant 0 : index
    %c0_7 = arith.constant 0 : index
    %10 = vector.load %arg5[%c0_6, %c0_7] : memref<256x256xbf16, #tpu.memory_space<vmem>>, vector<256x256xbf16>
    %cst_8 = arith.constant dense<0.000000e+00> : vector<8x256xf32>
    %11 = tpu.matmul %9, %10, %cst_8 {dimension_numbers = #tpu.dot_dimension_numbers<[1], [0], [0], [1], [0, 0, 1, 1], [], []>} : vector<8x256xbf16>, vector<256x256xbf16>, vector<8x256xf32> -> vector<8x256xf32>
    %c0_9 = arith.constant 0 : index
    %c0_10 = arith.constant 0 : index
    %12 = vector.load %arg6[%c0_9, %c0_10] : memref<1x256xf32, #tpu.memory_space<vmem>>, vector<1x256xf32>
    %13 = vector.broadcast %12 : vector<1x256xf32> to vector<8x256xf32>
    %14 = arith.addf %11, %13 : vector<8x256xf32>
    %cst_11 = arith.constant 0.000000e+00 : f32
    %15 = vector.broadcast %cst_11 : f32 to vector<8x256xf32>
    %16 = arith.maximumf %14, %15 : vector<8x256xf32>
    %17 = arith.truncf %16 : vector<8x256xf32> to vector<8x256xbf16>
    %c0_12 = arith.constant 0 : index
    %c0_13 = arith.constant 0 : index
    %18 = vector.load %arg7[%c0_12, %c0_13] : memref<256x64xbf16, #tpu.memory_space<vmem>>, vector<256x64xbf16>
    %cst_14 = arith.constant dense<0.000000e+00> : vector<8x64xf32>
    %19 = tpu.matmul %17, %18, %cst_14 {dimension_numbers = #tpu.dot_dimension_numbers<[1], [0], [0], [1], [0, 0, 1, 1], [], []>} : vector<8x256xbf16>, vector<256x64xbf16>, vector<8x64xf32> -> vector<8x64xf32>
    %c0_15 = arith.constant 0 : index
    %c0_16 = arith.constant 0 : index
    %20 = vector.load %arg8[%c0_15, %c0_16] : memref<1x64xf32, #tpu.memory_space<vmem>>, vector<1x64xf32>
    %21 = vector.broadcast %20 : vector<1x64xf32> to vector<8x64xf32>
    %22 = arith.addf %19, %21 : vector<8x64xf32>
    %23 = vector.extract_strided_slice %22 {offsets = [0, 0], sizes = [8, 32], strides = [1, 1]} : vector<8x64xf32> to vector<8x32xf32>
    %24 = vector.extract_strided_slice %22 {offsets = [0, 32], sizes = [8, 32], strides = [1, 1]} : vector<8x64xf32> to vector<8x32xf32>
    %c0_17 = arith.constant 0 : index
    %c0_18 = arith.constant 0 : index
    %25 = vector.load %arg2[%c0_17, %c0_18] : memref<8x32xf32, #tpu.memory_space<vmem>>, vector<8x32xf32>
    %cst_19 = arith.constant 5.000000e-01 : f32
    %26 = vector.broadcast %cst_19 : f32 to vector<8x32xf32>
    %27 = arith.mulf %26, %24 : vector<8x32xf32>
    %28 = math.exp %27 : vector<8x32xf32>
    %29 = arith.mulf %25, %28 : vector<8x32xf32>
    %30 = arith.addf %23, %29 : vector<8x32xf32>
    %31 = arith.truncf %30 : vector<8x32xf32> to vector<8x32xbf16>
    %c0_20 = arith.constant 0 : index
    %c0_21 = arith.constant 0 : index
    %32 = vector.load %arg9[%c0_20, %c0_21] : memref<32x256xbf16, #tpu.memory_space<vmem>>, vector<32x256xbf16>
    %cst_22 = arith.constant dense<0.000000e+00> : vector<8x256xf32>
    %33 = tpu.matmul %31, %32, %cst_22 {dimension_numbers = #tpu.dot_dimension_numbers<[1], [0], [0], [1], [0, 0, 1, 1], [], []>} : vector<8x32xbf16>, vector<32x256xbf16>, vector<8x256xf32> -> vector<8x256xf32>
    %c0_23 = arith.constant 0 : index
    %c0_24 = arith.constant 0 : index
    %34 = vector.load %arg10[%c0_23, %c0_24] : memref<1x256xf32, #tpu.memory_space<vmem>>, vector<1x256xf32>
    %35 = vector.broadcast %34 : vector<1x256xf32> to vector<8x256xf32>
    %36 = arith.addf %33, %35 : vector<8x256xf32>
    %cst_25 = arith.constant 0.000000e+00 : f32
    %37 = vector.broadcast %cst_25 : f32 to vector<8x256xf32>
    %38 = arith.maximumf %36, %37 : vector<8x256xf32>
    %39 = arith.truncf %38 : vector<8x256xf32> to vector<8x256xbf16>
    %c0_26 = arith.constant 0 : index
    %c0_27 = arith.constant 0 : index
    %40 = vector.load %arg11[%c0_26, %c0_27] : memref<256x256xbf16, #tpu.memory_space<vmem>>, vector<256x256xbf16>
    %cst_28 = arith.constant dense<0.000000e+00> : vector<8x256xf32>
    %41 = tpu.matmul %39, %40, %cst_28 {dimension_numbers = #tpu.dot_dimension_numbers<[1], [0], [0], [1], [0, 0, 1, 1], [], []>} : vector<8x256xbf16>, vector<256x256xbf16>, vector<8x256xf32> -> vector<8x256xf32>
    %c0_29 = arith.constant 0 : index
    %c0_30 = arith.constant 0 : index
    %42 = vector.load %arg12[%c0_29, %c0_30] : memref<1x256xf32, #tpu.memory_space<vmem>>, vector<1x256xf32>
    %43 = vector.broadcast %42 : vector<1x256xf32> to vector<8x256xf32>
    %44 = arith.addf %41, %43 : vector<8x256xf32>
    %cst_31 = arith.constant 0.000000e+00 : f32
    %45 = vector.broadcast %cst_31 : f32 to vector<8x256xf32>
    %46 = arith.maximumf %44, %45 : vector<8x256xf32>
    %47 = arith.truncf %46 : vector<8x256xf32> to vector<8x256xbf16>
    %c0_32 = arith.constant 0 : index
    %c0_33 = arith.constant 0 : index
    %48 = vector.load %arg13[%c0_32, %c0_33] : memref<256x16xbf16, #tpu.memory_space<vmem>>, vector<256x16xbf16>
    %cst_34 = arith.constant dense<0.000000e+00> : vector<8x16xf32>
    %49 = tpu.matmul %47, %48, %cst_34 {dimension_numbers = #tpu.dot_dimension_numbers<[1], [0], [0], [1], [0, 0, 1, 1], [], []>} : vector<8x256xbf16>, vector<256x16xbf16>, vector<8x16xf32> -> vector<8x16xf32>
    %c0_35 = arith.constant 0 : index
    %c0_36 = arith.constant 0 : index
    %50 = vector.load %arg14[%c0_35, %c0_36] : memref<1x16xf32, #tpu.memory_space<vmem>>, vector<1x16xf32>
    %51 = vector.broadcast %50 : vector<1x16xf32> to vector<8x16xf32>
    %52 = arith.addf %49, %51 : vector<8x16xf32>
    %c0_37 = arith.constant 0 : index
    %c0_38 = arith.constant 0 : index
    %53 = vector.load %arg15[%c0_37, %c0_38] : memref<8x16xf32, #tpu.memory_space<vmem>>, vector<8x16xf32>
    tpu.vector_store %arg15[%c0_37, %c0_38], %52 {strides = array<i32>} : memref<8x16xf32, #tpu.memory_space<vmem>>, vector<8x16xf32>,
    %c0_39 = arith.constant 0 : index
    %c0_40 = arith.constant 0 : index
    %54 = vector.load %arg16[%c0_39, %c0_40] : memref<8x64xf32, #tpu.memory_space<vmem>>, vector<8x64xf32>
    tpu.vector_store %arg16[%c0_39, %c0_40], %22 {strides = array<i32>} : memref<8x64xf32, #tpu.memory_space<vmem>>, vector<8x64xf32>,
    return
  }
  func.func @transform_0(%arg0: i32) -> (i32, i32) {
    %c0_i32 = arith.constant 0 : i32
    %c0_i32_0 = arith.constant 0 : i32
    return %arg0, %c0_i32 : i32, i32
  }
  func.func @transform_1(%arg0: i32) -> (i32, i32) {
    %c0_i32 = arith.constant 0 : i32
    %c0_i32_0 = arith.constant 0 : i32
    return %arg0, %c0_i32 : i32, i32
  }
  func.func @transform_2(%arg0: i32) -> (i32, i32) {
    %c0_i32 = arith.constant 0 : i32
    %c0_i32_0 = arith.constant 0 : i32
    %c0_i32_1 = arith.constant 0 : i32
    return %c0_i32, %c0_i32_0 : i32, i32
  }
  func.func @transform_3(%arg0: i32) -> (i32, i32) {
    %c0_i32 = arith.constant 0 : i32
    %c0_i32_0 = arith.constant 0 : i32
    %c0_i32_1 = arith.constant 0 : i32
    return %c0_i32, %c0_i32_0 : i32, i32
  }
  func.func @transform_4(%arg0: i32) -> (i32, i32) {
    %c0_i32 = arith.constant 0 : i32
    %c0_i32_0 = arith.constant 0 : i32
    %c0_i32_1 = arith.constant 0 : i32
    return %c0_i32, %c0_i32_0 : i32, i32
  }
  func.func @transform_5(%arg0: i32) -> (i32, i32) {
    %c0_i32 = arith.constant 0 : i32
    %c0_i32_0 = arith.constant 0 : i32
    %c0_i32_1 = arith.constant 0 : i32
    return %c0_i32, %c0_i32_0 : i32, i32
  }
  func.func @transform_6(%arg0: i32) -> (i32, i32) {
    %c0_i32 = arith.constant 0 : i32
    %c0_i32_0 = arith.constant 0 : i32
    %c0_i32_1 = arith.constant 0 : i32
    return %c0_i32, %c0_i32_0 : i32, i32
  }
  func.func @transform_7(%arg0: i32) -> (i32, i32) {
    %c0_i32 = arith.constant 0 : i32
    %c0_i32_0 = arith.constant 0 : i32
    %c0_i32_1 = arith.constant 0 : i32
    return %c0_i32, %c0_i32_0 : i32, i32
  }
  func.func @transform_8(%arg0: i32) -> (i32, i32) {
    %c0_i32 = arith.constant 0 : i32
    %c0_i32_0 = arith.constant 0 : i32
    %c0_i32_1 = arith.constant 0 : i32
    return %c0_i32, %c0_i32_0 : i32, i32
  }
  func.func @transform_9(%arg0: i32) -> (i32, i32) {
    %c0_i32 = arith.constant 0 : i32
    %c0_i32_0 = arith.constant 0 : i32
    %c0_i32_1 = arith.constant 0 : i32
    return %c0_i32, %c0_i32_0 : i32, i32
  }
  func.func @transform_10(%arg0: i32) -> (i32, i32) {
    %c0_i32 = arith.constant 0 : i32
    %c0_i32_0 = arith.constant 0 : i32
    %c0_i32_1 = arith.constant 0 : i32
    return %c0_i32, %c0_i32_0 : i32, i32
  }
  func.func @transform_11(%arg0: i32) -> (i32, i32) {
    %c0_i32 = arith.constant 0 : i32
    %c0_i32_0 = arith.constant 0 : i32
    %c0_i32_1 = arith.constant 0 : i32
    return %c0_i32, %c0_i32_0 : i32, i32
  }
  func.func @transform_12(%arg0: i32) -> (i32, i32) {
    %c0_i32 = arith.constant 0 : i32
    %c0_i32_0 = arith.constant 0 : i32
    %c0_i32_1 = arith.constant 0 : i32
    return %c0_i32, %c0_i32_0 : i32, i32
  }
  func.func @transform_13(%arg0: i32) -> (i32, i32) {
    %c0_i32 = arith.constant 0 : i32
    %c0_i32_0 = arith.constant 0 : i32
    %c0_i32_1 = arith.constant 0 : i32
    return %c0_i32, %c0_i32_0 : i32, i32
  }
  func.func @transform_14(%arg0: i32) -> (i32, i32) {
    %c0_i32 = arith.constant 0 : i32
    %c0_i32_0 = arith.constant 0 : i32
    return %arg0, %c0_i32 : i32, i32
  }
  func.func @transform_15(%arg0: i32) -> (i32, i32) {
    %c0_i32 = arith.constant 0 : i32
    %c0_i32_0 = arith.constant 0 : i32
    return %arg0, %c0_i32 : i32, i32
  }
}

</mosaic_0001>

<bundles_post_ra>
// kernel: vae_forward.1
= control target key start
LH: loop header
LB: loop body
LE: loop exit
PB: predicated region body
PF: predicated region fallthrough
CT: control target
= control target key end

     0   :  { %v1407_v2 = vmov 0   ;;  %vm77_vm0 = vcmask 130048   ;;  %s1851_s0 = inlined_call_operand.vmem [shape: f32[8,16], index: 0, kind: input, shape index: {}]   ;;  %s1852_s1 = inlined_call_operand.vmem [shape: f32[8,32], index: 1, kind: input, shape index: {}]   ;;  %s1853_s2 = inlined_call_operand.vmem [shape: bf16[16,256], index: 2, kind: input, shape index: {}]   ;;  %s1854_s3 = inlined_call_operand.vmem [shape: f32[1,256], index: 3, kind: input, shape index: {}]   ;;  %s1855_s4 = inlined_call_operand.vmem [shape: bf16[256,256], index: 4, kind: input, shape index: {}]   ;;  %s1856_s5 = inlined_call_operand.vmem [shape: f32[1,256], index: 5, kind: input, shape index: {}]   ;;  %s1857_s6 = inlined_call_operand.vmem [shape: bf16[256,64], index: 6, kind: input, shape index: {}]   ;;  %s1858_s7 = inlined_call_operand.vmem [shape: f32[1,64], index: 7, kind: input, shape index: {}]   ;;  %s1859_s8 = inlined_call_operand.vmem [shape: bf16[32,256], index: 8, kind: input, shape index: {}]   ;;  %s1860_s9 = inlined_call_operand.vmem [shape: f32[1,256], index: 9, kind: input, shape index: {}]   ;;  %s1861_s10 = inlined_call_operand.vmem [shape: bf16[256,256], index: 10, kind: input, shape index: {}]   ;;  %s1862_s11 = inlined_call_operand.vmem [shape: f32[1,256], index: 11, kind: input, shape index: {}]   ;;  %s1863_s12 = inlined_call_operand.vmem [shape: bf16[256,16], index: 12, kind: input, shape index: {}]   ;;  %s1864_s13 = inlined_call_operand.vmem [shape: f32[1,16], index: 13, kind: input, shape index: {}]   ;;  %s1865_s14 = inlined_call_operand.hbm [shape: f32[8,16], index: 14, kind: output, shape index: {0}]   ;;  %s1866_s15 = inlined_call_operand.vmem [shape: f32[8,64], index: 15, kind: output, shape index: {1}]  }
   0x1   :  { %v1244_v0 = vld [vmem:[%s1853_s2 + $0x4] ss:$8 sps:$4 sm:$0xff]   ;;  %v1246_v1 = vld [vmem:[%s1853_s2] ss:$8 sps:$4 sm:$0xff]   ;;  %113 = vmatprep.mubr.bf16.mxu1 %v1407_v2  ;;  %v1252_v7 = vld [vmem:[%s1855_s4 + $0x14] ss:$8 sps:$4 sm:$0xff]  }
   0x2   :  { %v51_v3 = vld [vmem:[%s1851_s0] sm:$0xff]  ;;  %81 = vmatprep.subr.bf16.mxu1 %v1244_v0  ;;  %v1250_v8 = vld [vmem:[%s1855_s4 + $0x10] ss:$8 sps:$4 sm:$0xff]   ;;  %v1258_v11 = vld [vmem:[%s1855_s4 + $0x34] ss:$8 sps:$4 sm:$0xff]  }
   0x3   :  { %v52_v4 = vpack.c.bf16 %v51_v3, %v51_v3  ;;  %v1249_v5 = vld [vmem:[%s1855_s4 + $0x4] ss:$8 sps:$4 sm:$0xff]   ;;  %82 = vmatpush1.bf16.msra.mxu1 %v1246_v1  ;;  %v1247_v6 = vld [vmem:[%s1855_s4] ss:$8 sps:$4 sm:$0xff]   ;;  %v1256_v12 = vld [vmem:[%s1855_s4 + $0x30] ss:$8 sps:$4 sm:$0xff]  }
   0x4   :  { %330 = vmatprep.subr.bf16.mxu1 %v1249_v5  ;;  %v1255_v9 = vld [vmem:[%s1855_s4 + $0x24] ss:$8 sps:$4 sm:$0xff]   ;;  %v1253_v10 = vld [vmem:[%s1855_s4 + $0x20] ss:$8 sps:$4 sm:$0xff]   ;;  %v1264_v15 = vld [vmem:[%s1855_s4 + $0x54] ss:$8 sps:$4 sm:$0xff]  }
   0x5   :  { %v1261_v13 = vld [vmem:[%s1855_s4 + $0x44] ss:$8 sps:$4 sm:$0xff]   ;;  %v1259_v14 = vld [vmem:[%s1855_s4 + $0x40] ss:$8 sps:$4 sm:$0xff]   ;;  %v1262_v16 = vld [vmem:[%s1855_s4 + $0x50] ss:$8 sps:$4 sm:$0xff]  }
   0x6   :  { %1093 = vmatmul.mubr.msk.bf16.vlgmr.msra.gmra.mrb[0].mxu1 %vm77_vm0, %v52_v4  ;;  %v1267_v17 = vld [vmem:[%s1855_s4 + $0x64] ss:$8 sps:$4 sm:$0xff]   ;;  %v1265_v18 = vld [vmem:[%s1855_s4 + $0x60] ss:$8 sps:$4 sm:$0xff]   ;;  %v1270_v19 = vld [vmem:[%s1855_s4 + $0x74] ss:$8 sps:$4 sm:$0xff]  }
   0x7   :  { %331 = vmatpush1.bf16.msra.mxu1 %v1247_v6  ;;  %v1268_v20 = vld [vmem:[%s1855_s4 + $0x70] ss:$8 sps:$4 sm:$0xff]   ;;  %v1273_v21 = vld [vmem:[%s1855_s4 + $0x84] ss:$8 sps:$4 sm:$0xff]   ;;  %v1271_v22 = vld [vmem:[%s1855_s4 + $0x80] ss:$8 sps:$4 sm:$0xff]  }
   0x8   :  { %332 = vmatprep.subr.bf16.mxu1 %v1252_v7  ;;  %v1276_v23 = vld [vmem:[%s1855_s4 + $0x94] ss:$8 sps:$4 sm:$0xff]   ;;  %v1274_v24 = vld [vmem:[%s1855_s4 + $0x90] ss:$8 sps:$4 sm:$0xff]   ;;  %v1279_v25 = vld [vmem:[%s1855_s4 + $0xa4] ss:$8 sps:$4 sm:$0xff]  }
   0x9   :  { %v1277_v26 = vld [vmem:[%s1855_s4 + $0xa0] ss:$8 sps:$4 sm:$0xff]   ;;  %v1282_v27 = vld [vmem:[%s1855_s4 + $0xb4] ss:$8 sps:$4 sm:$0xff]   ;;  %v1280_v28 = vld [vmem:[%s1855_s4 + $0xb0] ss:$8 sps:$4 sm:$0xff]  }
   0xa   :  { %v1285_v29 = vld [vmem:[%s1855_s4 + $0xc4] ss:$8 sps:$4 sm:$0xff]   ;;  %v1283_v30 = vld [vmem:[%s1855_s4 + $0xc0] ss:$8 sps:$4 sm:$0xff]   ;;  %v1288_v31 = vld [vmem:[%s1855_s4 + $0xd4] ss:$8 sps:$4 sm:$0xff]  }
   0xb   :  { %333 = vmatpush1.bf16.msra.mxu1 %v1250_v8  ;;  %v1286_v32 = vld [vmem:[%s1855_s4 + $0xd0] ss:$8 sps:$4 sm:$0xff]  }
   0xc   :  { %334 = vmatprep.subr.bf16.mxu1 %v1255_v9 }
   0xf   :  { %335 = vmatpush1.bf16.msra.mxu1 %v1253_v10 }
  0x10   :  { %336 = vmatprep.subr.bf16.mxu1 %v1258_v11 }
  0x13   :  { %337 = vmatpush1.bf16.msra.mxu1 %v1256_v12 }
  0x14   :  { %338 = vmatprep.subr.bf16.mxu1 %v1261_v13 }
  0x17   :  { %339 = vmatpush1.bf16.msra.mxu1 %v1259_v14 }
  0x18   :  { %340 = vmatprep.subr.bf16.mxu1 %v1264_v15 }
  0x1b   :  { %341 = vmatpush1.bf16.msra.mxu1 %v1262_v16 }
  0x1c   :  { %342 = vmatprep.subr.bf16.mxu1 %v1267_v17 }
  0x1f   :  { %343 = vmatpush1.bf16.msra.mxu1 %v1265_v18 }
  0x20   :  { %344 = vmatprep.subr.bf16.mxu1 %v1270_v19 }
  0x23   :  { %345 = vmatpush1.bf16.msra.mxu1 %v1268_v20 }
  0x24   :  { %346 = vmatprep.subr.bf16.mxu1 %v1273_v21 }
  0x27   :  { %347 = vmatpush1.bf16.msra.mxu1 %v1271_v22 }
  0x28   :  { %348 = vmatprep.subr.bf16.mxu1 %v1276_v23 }
  0x2b   :  { %349 = vmatpush1.bf16.msra.mxu1 %v1274_v24 }
  0x2c   :  { %350 = vmatprep.subr.bf16.mxu1 %v1279_v25 }
  0x2f   :  { %351 = vmatpush1.bf16.msra.mxu1 %v1277_v26 }
  0x30   :  { %352 = vmatprep.subr.bf16.mxu1 %v1282_v27 }
  0x33   :  { %353 = vmatpush1.bf16.msra.mxu1 %v1280_v28 }
  0x34   :  { %354 = vmatprep.subr.bf16.mxu1 %v1285_v29 }
  0x37   :  { %355 = vmatpush1.bf16.msra.mxu1 %v1283_v30 }
  0x38   :  { %21 = vsyncpa [#allocation3], 0  ;;  %356 = vmatprep.subr.bf16.mxu1 %v1288_v31  ;;  %v1291_v33 = vld [vmem:[%s1855_s4 + $0xe4] ss:$8 sps:$4 sm:$0xff]   ;;  %v1289_v34 = vld [vmem:[%s1855_s4 + $0xe0] ss:$8 sps:$4 sm:$0xff]   ;;  %v57_v49 = vlaneseq }
  0x39   :  { %v1294_v35 = vld [vmem:[%s1855_s4 + $0xf4] ss:$8 sps:$4 sm:$0xff]   ;;  %v1292_v36 = vld [vmem:[%s1855_s4 + $0xf0] ss:$8 sps:$4 sm:$0xff]   ;;  %v1295_v37 = vld [vmem:[%s1857_s6 + $0x40] sm:$0xff]   ;;  %vm1071_vm1 = vcmask 523264  }
  0x3a   :  { %v1296_v38 = vld [vmem:[%s1857_s6] sm:$0xff]   ;;  %v1297_v39 = vld [vmem:[%s1857_s6 + $0x48] sm:$0xff]   ;;  %1197 = vmatprep.subr.bf16.mxu0 %v1295_v37  ;;  %v1299_v41 = vld [vmem:[%s1857_s6 + $0x50] sm:$0xff]   ;;  %v58_v50 = vshrl.u32 %v57_v49, 7  ;;  %s1408_s2 = smov 96   ;;  %vm597_vm2 = vcmask 261120  }
  0x3b   :  { %357 = vmatpush1.bf16.msra.mxu1 %v1286_v32  ;;  %1198 = vmatpush3.bf16.msra.mxu0 %v1296_v38  ;;  %v1298_v40 = vld [vmem:[%s1857_s6 + $0x8] sm:$0xff]   ;;  %v1300_v42 = vld [vmem:[%s1857_s6 + $0x10] sm:$0xff]   ;;  %v1301_v43 = vld [vmem:[%s1857_s6 + $0x58] sm:$0xff]  }
  0x3c   :  { %358 = vmatprep.subr.bf16.mxu1 %v1291_v33  ;;  %1199 = vmatprep.subr.bf16.mxu0 %v1297_v39  ;;  %v1302_v44 = vld [vmem:[%s1857_s6 + $0x18] sm:$0xff]   ;;  %v1303_v45 = vld [vmem:[%s1857_s6 + $0x60] sm:$0xff]   ;;  %v1305_v47 = vld [vmem:[%s1857_s6 + $0x68] sm:$0xff]   ;;  %v1633_v51 = vsub.s32 0, %v58_v50  ;;  %v1638_v53 = vsub.s32 1, %v58_v50 }
  0x3d   :  { %v1304_v46 = vld [vmem:[%s1857_s6 + $0x20] sm:$0xff]   ;;  %v1306_v48 = vld [vmem:[%s1857_s6 + $0x28] sm:$0xff]   ;;  %v1307_v3 = vld [vmem:[%s1857_s6 + $0x70] sm:$0xff]  }
  0x3e   :  { %v55_v52 = vld [vmem:[%s1854_s3] sm:$0x3]  ;;  %v1308_v4 = vld [vmem:[%s1857_s6 + $0x30] sm:$0xff]   ;;  %v1309_v5 = vld [vmem:[%s1857_s6 + $0x78] sm:$0xff]  }
  0x3f   :  { %359 = vmatpush1.bf16.msra.mxu1 %v1289_v34  ;;  %1200 = vmatpush3.bf16.msra.mxu0 %v1298_v40  ;;  %v60_v54 = vrot.slane %v55_v52, %v1633_v51  ;;  %v64_v55 = vrot.slane %v55_v52, %v1638_v53  ;;  %v1310_v6 = vld [vmem:[%s1857_s6 + $0x38] sm:$0xff]   ;;  %v158_v7 = vld [vmem:[%s1856_s5] sm:$0x3]  ;;  %v1313_v21 = vld [vmem:[%s1859_s8 + $0x4] ss:$8 sps:$4 sm:$0xff]  }
  0x40   :  { %360 = vmatprep.subr.bf16.mxu1 %v1294_v35  ;;  %1201 = vmatprep.subr.bf16.mxu0 %v1299_v41  ;;  %v163_v8 = vrot.slane %v158_v7, %v1633_v51  ;;  %v167_v9 = vrot.slane %v158_v7, %v1638_v53  ;;  %v1311_v20 = vld [vmem:[%s1859_s8] ss:$8 sps:$4 sm:$0xff]   ;;  %v1316_v30 = vld [vmem:[%s1859_s8 + $0x14] ss:$8 sps:$4 sm:$0xff]   ;;  %v1314_v31 = vld [vmem:[%s1859_s8 + $0x10] ss:$8 sps:$4 sm:$0xff]  }
  0x41   :  { %v1126_v23 = vld [vmem:[%s1858_s7] ss:$0 sm:$0xff]  ;;  %v1319_v32 = vld [vmem:[%s1861_s10 + $0x4] ss:$8 sps:$4 sm:$0xff]   ;;  %v1322_v40 = vld [vmem:[%s1861_s10 + $0x14] ss:$8 sps:$4 sm:$0xff]  }
  0x42   :  { %v550_v34 = vld [vmem:[%s1852_s1] sm:$0xff]  ;;  %v1320_v41 = vld [vmem:[%s1861_s10 + $0x10] ss:$8 sps:$4 sm:$0xff]   ;;  %v1364_v7 = vld [vmem:[%s1861_s10 + $0xf4] ss:$8 sps:$4 sm:$0xff]  }
  0x43   :  { %361 = vmatpush1.bf16.msra.mxu1 %v1292_v36  ;;  %1202 = vmatpush3.bf16.msra.mxu0 %v1300_v42  ;;  %v1317_v38 = vld [vmem:[%s1861_s10] ss:$8 sps:$4 sm:$0xff]   ;;  %v1325_v42 = vld [vmem:[%s1861_s10 + $0x24] ss:$8 sps:$4 sm:$0xff]   ;;  %v1332_v49 = vld [vmem:[%s1861_s10 + $0x50] ss:$8 sps:$4 sm:$0xff]  }
  0x44   :  { %1203 = vmatprep.subr.bf16.mxu0 %v1301_v43  ;;  %v1323_v43 = vld [vmem:[%s1861_s10 + $0x20] ss:$8 sps:$4 sm:$0xff]   ;;  %v1337_v50 = vld [vmem:[%s1861_s10 + $0x64] ss:$8 sps:$4 sm:$0xff]  }
  0x45   :  { %v1335_v52 = vld [vmem:[%s1861_s10 + $0x60] ss:$8 sps:$4 sm:$0xff]  }
  0x47   :  { %1204 = vmatpush3.bf16.msra.mxu0 %v1302_v44  ;;  %v1328_v44 = vld [vmem:[%s1861_s10 + $0x34] ss:$8 sps:$4 sm:$0xff]  }
  0x48   :  { %1205 = vmatprep.subr.bf16.mxu0 %v1303_v45  ;;  %v1326_v45 = vld [vmem:[%s1861_s10 + $0x30] ss:$8 sps:$4 sm:$0xff]  }
  0x4b   :  { %1206 = vmatpush3.bf16.msra.mxu0 %v1304_v46  ;;  %v1331_v46 = vld [vmem:[%s1861_s10 + $0x44] ss:$8 sps:$4 sm:$0xff]  }
  0x4c   :  { %1207 = vmatprep.subr.bf16.mxu0 %v1305_v47  ;;  %v1329_v47 = vld [vmem:[%s1861_s10 + $0x40] ss:$8 sps:$4 sm:$0xff]  }
  0x4f   :  { %1208 = vmatpush3.bf16.msra.mxu0 %v1306_v48  ;;  %v1334_v48 = vld [vmem:[%s1861_s10 + $0x54] ss:$8 sps:$4 sm:$0xff]  }
  0x50   :  { %1209 = vmatprep.subr.bf16.mxu0 %v1307_v3  ;;  %v1358_v3 = vld [vmem:[%s1861_s10 + $0xd4] ss:$8 sps:$4 sm:$0xff]  }
  0x53   :  { %1210 = vmatpush3.bf16.msra.mxu0 %v1308_v4  ;;  %v1356_v4 = vld [vmem:[%s1861_s10 + $0xd0] ss:$8 sps:$4 sm:$0xff]  }
  0x54   :  { %1211 = vmatprep.subr.bf16.mxu0 %v1309_v5  ;;  %v1361_v5 = vld [vmem:[%s1861_s10 + $0xe4] ss:$8 sps:$4 sm:$0xff]  }
  0x57   :  { %1212 = vmatpush3.bf16.msra.mxu0 %v1310_v6  ;;  %v1359_v6 = vld [vmem:[%s1861_s10 + $0xe0] ss:$8 sps:$4 sm:$0xff]  }
  0x58   :  { %601 = vmatprep.subr.bf16.mxu0 %v1313_v21  ;;  %v565_v21 = vld [vmem:[%s1860_s9] sm:$0x3] }
  0xd9   :  { %v115_v56 = vpop.f32.mrb[0].mxu1 }
  0xda   :  { %v116_v57 = vadd.f32 %v115_v56, %v60_v54  ;;  %v117_v58 = vpop.f32.mrb[1].mxu1  ;;  %v1340_v54 = vld [vmem:[%s1861_s10 + $0x74] ss:$8 sps:$4 sm:$0xff]   ;;  %v1343_v56 = vld [vmem:[%s1861_s10 + $0x84] ss:$8 sps:$4 sm:$0xff]  }
  0xdb   :  { %v118_v59 = vadd.f32 %v117_v58, %v64_v55  ;;  %v119_v60 = vpop.f32.mrb[2].mxu1  ;;  %v1338_v55 = vld [vmem:[%s1861_s10 + $0x70] ss:$8 sps:$4 sm:$0xff]   ;;  %v1346_v58 = vld [vmem:[%s1861_s10 + $0x94] ss:$8 sps:$4 sm:$0xff]  }
  0xdc   :  { %v122_v61 = vmax.f32 %v116_v57, 0.0  ;;  %v120_v62 = vpop.f32.mrb[3].mxu1  ;;  %v1341_v57 = vld [vmem:[%s1861_s10 + $0x80] ss:$8 sps:$4 sm:$0xff]   ;;  %v1349_v60 = vld [vmem:[%s1861_s10 + $0xa4] ss:$8 sps:$4 sm:$0xff]  }
  0xdd   :  { %v123_v63 = vmax.f32 %v118_v59, 0.0  ;;  %v1344_v59 = vld [vmem:[%s1861_s10 + $0x90] ss:$8 sps:$4 sm:$0xff]   ;;  %v1352_v62 = vld [vmem:[%s1861_s10 + $0xb4] ss:$8 sps:$4 sm:$0xff]  }
  0xde   :  { %v124_v1 = vpack.c.bf16 %v122_v61, %v122_v61  ;;  %v1347_v61 = vld [vmem:[%s1861_s10 + $0xa0] ss:$8 sps:$4 sm:$0xff]  }
  0xdf   :  { %v125_v0 = vpack.c.bf16 %v123_v63, %v123_v63  ;;  %v1350_v63 = vld [vmem:[%s1861_s10 + $0xb0] ss:$8 sps:$4 sm:$0xff]  }
  0xe1   :  { %362 = vmatprep.mubr.bf16.mxu1 %v125_v0  ;;  %v1355_v0 = vld [vmem:[%s1861_s10 + $0xc4] ss:$8 sps:$4 sm:$0xff]  }
  0xe2   :  { %363 = vmatmul.mubr.bf16.vlgmr.msra.gmra.mrb[4].mxu1 %v124_v1  ;;  %v1353_v1 = vld [vmem:[%s1861_s10 + $0xc0] ss:$8 sps:$4 sm:$0xff]  }
 0x1b5   :  { %v364_v10 = vpop.f32.mrb[4].mxu1 }
 0x1b6   :  { %v365_v11 = vadd.f32 %v364_v10, %v163_v8  ;;  %v366_v12 = vpop.f32.mrb[5].mxu1  ;;  %v1362_v8 = vld [vmem:[%s1861_s10 + $0xf0] ss:$8 sps:$4 sm:$0xff]   ;;  %v1366_v10 = vld [vmem:[%s1863_s12] sm:$0xff]  }
 0x1b7   :  { %v367_v13 = vadd.f32 %v366_v12, %v167_v9  ;;  %v368_v14 = vpop.f32.mrb[6].mxu1  ;;  %v1365_v9 = vld [vmem:[%s1863_s12 + $0x40] sm:$0xff]   ;;  %v1368_v12 = vld [vmem:[%s1863_s12 + $0x8] sm:$0xff]  }
 0x1b8   :  { %v371_v15 = vmax.f32 %v365_v11, 0.0  ;;  %v369_v16 = vpop.f32.mrb[7].mxu1  ;;  %v1367_v11 = vld [vmem:[%s1863_s12 + $0x48] sm:$0xff]   ;;  %1219 = vmatprep.subr.bf16.mxu1 %v1365_v9  ;;  %v1370_v14 = vld [vmem:[%s1863_s12 + $0x10] sm:$0xff]  }
 0x1b9   :  { %v372_v17 = vmax.f32 %v367_v13, 0.0  ;;  %1220 = vmatpush3.bf16.msra.mxu1 %v1366_v10  ;;  %v1369_v13 = vld [vmem:[%s1863_s12 + $0x50] sm:$0xff]   ;;  %v1372_v16 = vld [vmem:[%s1863_s12 + $0x18] sm:$0xff]  }
 0x1ba   :  { %v373_v19 = vpack.c.bf16 %v371_v15, %v371_v15  ;;  %1221 = vmatprep.subr.bf16.mxu1 %v1367_v11  ;;  %v1371_v15 = vld [vmem:[%s1863_s12 + $0x58] sm:$0xff]  }
 0x1bb   :  { %v374_v18 = vpack.c.bf16 %v372_v17, %v372_v17  ;;  %v1373_v17 = vld [vmem:[%s1863_s12 + $0x60] sm:$0xff]  }
 0x1bd   :  { %542 = vmatprep.mubr.bf16.mxu0 %v374_v18  ;;  %1222 = vmatpush3.bf16.msra.mxu1 %v1368_v12  ;;  %v1374_v18 = vld [vmem:[%s1863_s12 + $0x20] sm:$0xff]  }
 0x1be   :  { %543 = vmatmul.mubr.bf16.vlgmr.msra.gmra.mrb[0].mxu0 %v373_v19  ;;  %1223 = vmatprep.subr.bf16.mxu1 %v1369_v13  ;;  %v1375_v19 = vld [vmem:[%s1863_s12 + $0x68] sm:$0xff]  }
 0x1bf   :  { %633 = vmatprep.mubr.bf16.mxu0 %v1407_v2  ;;  %602 = vmatpush1.bf16.msra.mxu0 %v1311_v20  ;;  %v1376_v20 = vld [vmem:[%s1863_s12 + $0x28] sm:$0xff]  }
 0x1c0   :  { %603 = vmatprep.subr.bf16.mxu0 %v1316_v30 }
 0x1c1   :  { %1224 = vmatpush3.bf16.msra.mxu1 %v1370_v14 }
 0x1c2   :  { %1225 = vmatprep.subr.bf16.mxu1 %v1371_v15 }
 0x1c3   :  { %604 = vmatpush1.bf16.msra.mxu0 %v1314_v31 }
 0x1c4   :  { %850 = vmatprep.subr.bf16.mxu0 %v1319_v32 }
 0x1c5   :  { %1226 = vmatpush3.bf16.msra.mxu1 %v1372_v16 }
 0x1c6   :  { %1227 = vmatprep.subr.bf16.mxu1 %v1373_v17 }
 0x1c9   :  { %1228 = vmatpush3.bf16.msra.mxu1 %v1374_v18 }
 0x1ca   :  { %1229 = vmatprep.subr.bf16.mxu1 %v1375_v19 }
 0x1cd   :  { %1230 = vmatpush3.bf16.msra.mxu1 %v1376_v20 }
 0x291   :  { %v1213_v22 = vpop.f32.mrb[0].mxu0 }
 0x292   :  { %v1214_v24 = vpop.f32.mrb[1].mxu0 }
 0x293   :  { %v1215_v25 = vadd.f32 %v1214_v24, %v1213_v22  ;;  %v1216_v26 = vpop.f32.mrb[2].mxu0  ;;  %v570_v22 = vrot.slane %v565_v21, %v1633_v51 }
 0x294   :  { %v1217_v2 = vpop.f32.mrb[3].mxu0 }
 0x295   :  { %v545_v27 = vadd.f32 %v1215_v25, %v1126_v23  ;;  %v574_v23 = vrot.slane %v565_v21, %v1638_v53 }
 0x297   :  { %v551_v28 = vmul.f32 0.5, %v545_v27  ;;  %1072 = vst.msk [vmem:[%s1866_s15] sm:$0xff] %vm1071_vm1, %v545_v27 }
 0x299   :  { %v552_v29 = vmul.f32 1.442695, %v551_v28 }
 0x29b   :  { %1381 = vpow2.f32 %v552_v29 }
 0x2a5   :  { %v1382_v33 = vpop.eup %1381 }
 0x2a6   :  { %555 = vrot.lane.b32.xlu0 %v1382_v33, %s1408_s2  ;;  %v1377_v33 = vld [vmem:[%s1863_s12 + $0x70] sm:$0xff]  }
 0x2a7   :  { %1231 = vmatprep.subr.bf16.mxu1 %v1377_v33 }
 0x318   :  { %v556_v35 = vpop.permute.xlu0 %555 }
 0x319   :  { %v558_v36 = vmul.f32 %v556_v35, %v550_v34  ;;  %v1378_v34 = vld [vmem:[%s1863_s12 + $0x30] sm:$0xff]   ;;  %v1379_v35 = vld [vmem:[%s1863_s12 + $0x78] sm:$0xff]  }
 0x31a   :  { %1232 = vmatpush3.bf16.msra.mxu1 %v1378_v34 }
 0x31b   :  { %v559_v37 = vadd.f32 %v558_v36, %v545_v27  ;;  %v1380_v36 = vld [vmem:[%s1863_s12 + $0x38] sm:$0xff]   ;;  %1233 = vmatprep.subr.bf16.mxu1 %v1379_v35 }
 0x31d   :  { %v560_v39 = vpack.c.bf16 %v559_v37, %v559_v37  ;;  %v678_v37 = vld [vmem:[%s1862_s11] sm:$0x3]  ;;  %s1409_s11 = smov [#allocation2]  }
 0x31e   :  { %1234 = vmatpush3.bf16.msra.mxu1 %v1380_v36  ;;  %s1079_s3 = sshll.u32 %s1409_s11, 4  ;;  %s1080_s3 = int_to_ptr.vmem [resolvable:$true] %s1079_s3 }
 0x31f   :  { %1147 = vmatmul.mubr.msk.bf16.vlgmr.msra.gmra.mrb[4].mxu0 %vm597_vm2, %v560_v39  ;;  %v687_v39 = vrot.slane %v678_v37, %v1638_v53  ;;  %s1383_s2 = scalar_lea.vmem %s1080_s3, 128  ;;  %p1388_p1 = scmp.lt.s32.totalorder %s1080_s3, %s1080_s3 }
 0x320   :  { %851 = vmatpush1.bf16.msra.mxu0 %v1317_v38  ;;  %v683_v38 = vrot.slane %v678_v37, %v1633_v51  ;;  %p1384_p0 = scmp.ne.s32.totalorder %s1080_s3, %s1383_s2  ;;  %p1389_p2 = scmp.lt.s32.totalorder %s1383_s2, %s1383_s2 }
 0x321   :  { %852 = vmatprep.subr.bf16.mxu0 %v1322_v40 }
 0x322   :  { %p1390_p3 = por %p1389_p2, %p1388_p1 }
 0x324   :  { %853 = vmatpush1.bf16.msra.mxu0 %v1320_v41  ;;  %p1391_p4 = pnand %p1390_p3, %p1384_p0 }
 0x325   :  { %854 = vmatprep.subr.bf16.mxu0 %v1325_v42 }
 0x328   :  { %855 = vmatpush1.bf16.msra.mxu0 %v1323_v43 }
 0x329   :  { %856 = vmatprep.subr.bf16.mxu0 %v1328_v44 }
 0x32c   :  { %857 = vmatpush1.bf16.msra.mxu0 %v1326_v45 }
 0x32d   :  { %858 = vmatprep.subr.bf16.mxu0 %v1331_v46 }
 0x330   :  { %859 = vmatpush1.bf16.msra.mxu0 %v1329_v47 }
 0x331   :  { %860 = vmatprep.subr.bf16.mxu0 %v1334_v48 }
 0x334   :  { %861 = vmatpush1.bf16.msra.mxu0 %v1332_v49 }
 0x335   :  { %862 = vmatprep.subr.bf16.mxu0 %v1337_v50 }
 0x338   :  { %863 = vmatpush1.bf16.msra.mxu0 %v1335_v52  ;;  %v1180_v52 = vld [vmem:[%s1864_s13] ss:$0 sm:$0xff] }
 0x339   :  { %864 = vmatprep.subr.bf16.mxu0 %v1340_v54 }
 0x33c   :  { %865 = vmatpush1.bf16.msra.mxu0 %v1338_v55 }
 0x33d   :  { %866 = vmatprep.subr.bf16.mxu0 %v1343_v56 }
 0x340   :  { %867 = vmatpush1.bf16.msra.mxu0 %v1341_v57 }
 0x341   :  { %868 = vmatprep.subr.bf16.mxu0 %v1346_v58 }
 0x344   :  { %869 = vmatpush1.bf16.msra.mxu0 %v1344_v59 }
 0x345   :  { %870 = vmatprep.subr.bf16.mxu0 %v1349_v60 }
 0x348   :  { %871 = vmatpush1.bf16.msra.mxu0 %v1347_v61 }
 0x349   :  { %872 = vmatprep.subr.bf16.mxu0 %v1352_v62 }
 0x34c   :  { %873 = vmatpush1.bf16.msra.mxu0 %v1350_v63 }
 0x34d   :  { %874 = vmatprep.subr.bf16.mxu0 %v1355_v0 }
 0x350   :  { %875 = vmatpush1.bf16.msra.mxu0 %v1353_v1 }
 0x351   :  { %876 = vmatprep.subr.bf16.mxu0 %v1358_v3 }
 0x354   :  { %877 = vmatpush1.bf16.msra.mxu0 %v1356_v4 }
 0x355   :  { %878 = vmatprep.subr.bf16.mxu0 %v1361_v5 }
 0x358   :  { %879 = vmatpush1.bf16.msra.mxu0 %v1359_v6 }
 0x359   :  { %880 = vmatprep.subr.bf16.mxu0 %v1364_v7 }
 0x35c   :  { %881 = vmatpush1.bf16.msra.mxu0 %v1362_v8 }
 0x3f2   :  { %v635_v24 = vpop.f32.mrb[4].mxu0 }
 0x3f3   :  { %v636_v25 = vadd.f32 %v635_v24, %v570_v22  ;;  %v637_v26 = vpop.f32.mrb[5].mxu0 }
 0x3f4   :  { %v638_v2 = vadd.f32 %v637_v26, %v574_v23  ;;  %v639_v27 = vpop.f32.mrb[6].mxu0 }
 0x3f5   :  { %v642_v28 = vmax.f32 %v636_v25, 0.0  ;;  %v640_v29 = vpop.f32.mrb[7].mxu0 }
 0x3f6   :  { %v643_v30 = vmax.f32 %v638_v2, 0.0 }
 0x3f7   :  { %v644_v32 = vpack.c.bf16 %v642_v28, %v642_v28 }
 0x3f8   :  { %v645_v31 = vpack.c.bf16 %v643_v30, %v643_v30 }
 0x3fa   :  { %882 = vmatprep.mubr.bf16.mxu0 %v645_v31 }
 0x3fb   :  { %883 = vmatmul.mubr.bf16.vlgmr.msra.gmra.mrb[8].mxu0 %v644_v32 }
 0x4ce   :  { %v884_v40 = vpop.f32.mrb[8].mxu0 }
 0x4cf   :  { %v885_v41 = vadd.f32 %v884_v40, %v683_v38  ;;  %v886_v42 = vpop.f32.mrb[9].mxu0 }
 0x4d0   :  { %v887_v43 = vadd.f32 %v886_v42, %v687_v39  ;;  %v888_v44 = vpop.f32.mrb[10].mxu0 }
 0x4d1   :  { %v891_v45 = vmax.f32 %v885_v41, 0.0  ;;  %v889_v46 = vpop.f32.mrb[11].mxu0 }
 0x4d2   :  { %v892_v47 = vmax.f32 %v887_v43, 0.0 }
 0x4d3   :  { %v893_v49 = vpack.c.bf16 %v891_v45, %v891_v45 }
 0x4d4   :  { %v894_v48 = vpack.c.bf16 %v892_v47, %v892_v47 }
 0x4d6   :  { %1062 = vmatprep.mubr.bf16.mxu1 %v894_v48 }
 0x4d7   :  { %1063 = vmatmul.mubr.bf16.vlgmr.msra.gmra.mrb[8].mxu1 %v893_v49 }
 0x5aa   :  { %v1235_v50 = vpop.f32.mrb[8].mxu1 }
 0x5ab   :  { %v1236_v51 = vpop.f32.mrb[9].mxu1 }
 0x5ac   :  { %v1237_v53 = vadd.f32 %v1236_v51, %v1235_v50  ;;  %v1238_v54 = vpop.f32.mrb[10].mxu1 }
 0x5ad   :  { %v1239_v55 = vpop.f32.mrb[11].mxu1 }
 0x5ae   :  { %v1065_v56 = vadd.f32 %v1237_v53, %v1180_v52 }
 0x5b0   :  { %1070 = vst.msk [vmem:[#allocation2] sm:$0xff] %vm77_vm0, %v1065_v56 }
 0x5b1   :  { %1394 = shalt.err (!%p1391_p4)
}
 0x5b2   :  { %s1395_s13 = scalar_lea.hbm %s1865_s14, 128 }
 0x5b3   :  { %p1396_p5 = scmp.ne.s32.totalorder %s1865_s14, %s1395_s13  ;;  %p1399_p6 = scmp.lt.u32.totalorder %s1395_s13, %s1865_s14 }
 0x5b5   :  { %p1401_p7 = pnand %p1399_p6, %p1396_p5 }
 0x5b7   :  { %1404 = shalt.err (!%p1401_p7)
}
 0x5b8   :  { %1082 = dma.vmem_to_hbm [thread:$0]  %s1080_s3, 128, %s1865_s14, [#allocation3]  }
 0x5b9   :  { %1405 = dma.done.wait [#allocation3], 128  }
 0x5ba   :  { %1406 = vsyncadd [#allocation3], 4294967168 }
 0x5bb   :  { %1090 = vsyncpa [#allocation3], 1 }

</bundles_post_ra>
